<compile_context>
chip_gen: v7x
topology: tpu7x:2x2x1
jax: 0.10.0
libtpu: 0.0.40
codegen_flags: <defaults>
</compile_context>

<pallas_src>
import math
from functools import partial

import jax
import jax.numpy as jnp
from jax import lax
from jax.experimental import pallas as pl
from jax.experimental.pallas import tpu as pltpu

NEG_SLOPE = 0.2          # GATv2Conv default negative_slope
_MASK_NEG = -1e30        # masked-logit value (f32 math only)


# ----------------------------------------------------------------------------
# Hardware-aware configuration
# ----------------------------------------------------------------------------
def _detect_tpu():
    gen = 6
    try:
        kind = jax.devices()[0].device_kind.lower()
        for g in (7, 6, 5, 4, 3, 2):
            if (f"v{g}" in kind) or kind.startswith(f"tpu{g}"):
                gen = g
                break
    except Exception:
        pass
    try:
        cap = int(pltpu.get_tpu_info().vmem_capacity_bytes)
    except Exception:
        cap = (64 << 20) if gen >= 7 else (128 << 20)
    return gen, cap


_TPU_GEN, _VMEM_CAP = _detect_tpu()
_HAS_BF16_VPU = _TPU_GEN >= 6                      # v6e / v7x VPU+EUP do bf16
_COMPUTE_DTYPE = jnp.bfloat16 if _HAS_BF16_VPU else jnp.float32
_MAX_NODE_TILE = 256 if _HAS_BF16_VPU else 128     # 256x256 MXU on v6e/v7x


# ----------------------------------------------------------------------------
# Tiling helpers
# ----------------------------------------------------------------------------
def _round_up(x, m):
    return ((x + m - 1) // m) * m


def _node_tiles(n, max_tile):
    """Pad n to a TPU-friendly size and pick a row tile that divides it."""
    if n <= max_tile:
        n_pad = _round_up(n, 16)
        return n_pad, n_pad
    n_pad = _round_up(n, max_tile)
    return n_pad, max_tile          # >= 2 grid steps -> both v7x TCs busy


def _j_tile(n_pad):
    """Lane-dense source-node block that always divides n_pad."""
    return 128 if n_pad % 128 == 0 else n_pad


def _misc_vmem_limit():
    return int(min(64 << 20, (_VMEM_CAP * 3) // 4))


def _attn_vmem_limit(tile_i, tile_j, n_pad, hf, heads):
    """Scoped-VMEM request sized from the actual working set (+ headroom)."""
    resident = 2 * (2 * n_pad * hf * 4 + heads * n_pad * 4)    # xl + xlT + lT (dbl-buffered)
    per_tile = 2 * (2 * tile_i * hf * 4 + tile_i * n_pad)      # xr/out (f32) + int8 adj rows
    interm = 8 * tile_i * tile_j * 4                           # per-j-block temporaries
    est = resident + per_tile + interm + (4 << 20)
    hi = int((_VMEM_CAP * 3) // 4)        # ~96 MiB on v5e/v6e, ~48 MiB on v7x
    lo = min(32 << 20, hi)
    return int(min(hi, max(lo, est)))


# ----------------------------------------------------------------------------
# Pallas kernels
# ----------------------------------------------------------------------------
def _gat_project_kernel(x_ref, w_ref, b_ref, attbd_ref,
                        xl_ref, xr_ref, xlt_ref, lt_ref):
    """Fused projection for one row tile.

    Computes y = x @ [Wl | Wr] + [bl | br] in ONE MXU matmul, splits into
    xl / xr, and also emits (hoisted out of the attention kernel):
       xl^T block  [HF, TI]
       lT block    [H,  TI] = slope * att_blockdiag @ xl^T
    """
    hf = xl_ref.shape[1]
    xb = x_ref[...].astype(jnp.bfloat16)
    w = w_ref[...].astype(jnp.bfloat16)
    y = jnp.dot(xb, w, preferred_element_type=jnp.float32) + b_ref[...]   # [TI, 2HF]
    xl = y[:, :hf]
    xr = y[:, hf:]
    xl_ref[...] = xl.astype(xl_ref.dtype)
    xr_ref[...] = xr.astype(xr_ref.dtype)
    xlt = xl.T                                                            # [HF, TI]
    xlt_ref[...] = xlt.astype(xlt_ref.dtype)
    lt_ref[...] = jnp.dot(attbd_ref[...], xlt,
                          preferred_element_type=jnp.float32)             # [H, TI]


def _gat_attn_kernel(xr_ref, xl_ref, xlt_ref, lt_ref, adj_ref, atts_ref,
                     bias_ref, out_ref, *, heads, out_dim, apply_relu,
                     tile_j, compute_dtype):
    """GATv2 attention + aggregation for one block of TI target nodes.

    Online (flash-style) softmax over source-node j-blocks; per-head result is
    written straight into its output column slice.

    xr_ref   : [TI, HF]  target projections, compute dtype
    xl_ref   : [NP, HF]  source projections, bf16 (MXU aggregation operand)
    xlt_ref  : [HF, NP]  xl transposed, compute dtype (hoisted)
    lt_ref   : [H,  NP]  slope * att . xl_j   rank-1 j-term (hoisted)
    adj_ref  : [TI, NP]  int8 neighbour mask rows (self loops included)
    atts_ref : [H, F]    (1 - slope) * att  (SMEM scalars)
    bias_ref : [1, HF]   output bias
    out_ref  : [TI, HF]
    """
    f32 = jnp.float32
    cdt = compute_dtype
    ti = xr_ref.shape[0]
    n_pad = xl_ref.shape[0]
    n_j = n_pad // tile_j

    xr_c = xr_ref[...].astype(cdt)                           # [TI, HF]
    bias = bias_ref[...]                                     # [1, HF] f32

    for h in range(heads):
        c0 = h * out_dim

        def j_body(jc, carry, c0=c0, h=h):
            m, l, acc = carry
            j0 = pl.multiple_of(jc * tile_j, tile_j)
            xlt_blk = xlt_ref[c0:c0 + out_dim, pl.ds(j0, tile_j)].astype(cdt)  # [F, TJ]
            adj_blk = adj_ref[:, pl.ds(j0, tile_j)]                            # [TI,TJ] int8
            lt_blk = lt_ref[h:h + 1, pl.ds(j0, tile_j)]                        # [1, TJ] f32
            xl_blk = xl_ref[pl.ds(j0, tile_j),
                            c0:c0 + out_dim].astype(jnp.bfloat16)              # [TJ, F]

            # pairwise (1-slope)*relu term: broadcast-add / max / scale in the
            # compute dtype (bf16 on v6e/v7x, f32 on v5e); accumulate in f32.
            q = jnp.zeros((ti, tile_j), f32)
            for k in range(out_dim):
                a_k = atts_ref[h, k].astype(cdt)
                z = xr_c[:, c0 + k:c0 + k + 1] + xlt_blk[k:k + 1, :]           # [TI, TJ]
                q = q + (a_k * jnp.maximum(z, 0)).astype(f32)

            # masked logits: single select on int8 adjacency (no f32 mask)
            s = jnp.where(adj_blk > 0, q + lt_blk, _MASK_NEG)                  # [TI, TJ]

            # online softmax update
            m_blk = jnp.max(s, axis=1, keepdims=True)
            m_new = jnp.maximum(m, m_blk)
            alpha = jnp.exp(m - m_new)                                         # [TI, 1]
            p = jnp.exp((s - m_new).astype(cdt))                               # EUP in cdt
            l_new = alpha * l + jnp.sum(p.astype(f32), axis=1, keepdims=True)
            acc_new = alpha * acc + jnp.dot(p.astype(jnp.bfloat16), xl_blk,
                                            preferred_element_type=f32)        # [TI, F]
            return m_new, l_new, acc_new

        m0 = jnp.full((ti, 1), _MASK_NEG, f32)
        l0 = jnp.zeros((ti, 1), f32)
        acc0 = jnp.zeros((ti, out_dim), f32)
        m, l, acc = lax.fori_loop(0, n_j, j_body, (m0, l0, acc0),
                                  unroll=(n_j <= 4))

        out_h = acc * pl.reciprocal(l, approx=True) + bias[:, c0:c0 + out_dim]
        if apply_relu:
            out_h = jnp.maximum(out_h, 0.0)
        out_ref[:, c0:c0 + out_dim] = out_h.astype(out_ref.dtype)


def _mlp_kernel(*refs, n_layers):
    """Fused chain of Linear(+ReLU) layers; refs = (x, w0, b0, ..., out)."""
    x_ref = refs[0]
    out_ref = refs[-1]
    h = x_ref[...]
    for li in range(n_layers):
        w = refs[1 + 2 * li][...].astype(jnp.bfloat16)
        b = refs[2 + 2 * li][...]
        h = jnp.dot(h.astype(jnp.bfloat16), w, preferred_element_type=jnp.float32) + b
        h = jnp.maximum(h, 0.0)
    out_ref[...] = h.astype(out_ref.dtype)


def _edge_classifier_kernel(src_ref, dst_ref, h_ref, w_ref, b_ref,
                            out_ref, e_ref):
    """Real edge gather (indices in SMEM) + concat + classifier matmul.

    src_ref/dst_ref : SMEM int32 [E_pad]  edge endpoints
    h_ref           : [NP, D]   node features (resident)
    w_ref, b_ref    : classifier weight [2D, C_pad] / bias [1, C_pad]
    out_ref         : [TE, C_pad]   (lane-dense padded classes)
    e_ref           : [TE, 2D]      exact gathered features (module output)
    """
    te = out_ref.shape[0]
    d = h_ref.shape[1]
    base = pl.program_id(0) * te

    @pl.loop(0, te)
    def _(r):
        s = src_ref[base + r]
        t = dst_ref[base + r]
        e_ref[pl.ds(r, 1), 0:d] = h_ref[pl.ds(s, 1), :]       # exact copy
        e_ref[pl.ds(r, 1), d:2 * d] = h_ref[pl.ds(t, 1), :]

    e = e_ref[...]
    out = jnp.dot(e.astype(jnp.bfloat16), w_ref[...].astype(jnp.bfloat16),
                  preferred_element_type=jnp.float32) + b_ref[...]
    out_ref[...] = out.astype(out_ref.dtype)


# ----------------------------------------------------------------------------
# Wrappers
# ----------------------------------------------------------------------------
def gatv2_layer(x, adj, p, *, heads, out_dim, tile_i, apply_relu=True):
    n_pad, f_in = x.shape
    hf = heads * out_dim
    n_tiles = n_pad // tile_i
    tile_j = _j_tile(n_pad)
    cdt = _COMPUTE_DTYPE

    # derived attention parameters (tiny glue, once per layer)
    att = p["att"]                                            # [H, F]
    eye = jnp.eye(heads, dtype=jnp.float32)
    att_bd = (NEG_SLOPE * (eye[:, :, None] * att[None, :, :])).reshape(heads, hf)
    att_s = (1.0 - NEG_SLOPE) * att                           # SMEM scalars
    w_cat = jnp.concatenate([p["wl"], p["wr"]], axis=1)       # [Fin, 2HF]
    b_cat = jnp.concatenate([p["bl"], p["br"]], axis=1)       # [1, 2HF]

    # --- fused projection (single matmul), also emits xl^T and lT ---
    xl, xr, xlt, lt = pl.pallas_call(
        _gat_project_kernel,
        grid=(n_tiles,),
        in_specs=[
            pl.BlockSpec((tile_i, f_in), lambda i: (i, 0)),
            pl.BlockSpec((f_in, 2 * hf), lambda i: (0, 0)),
            pl.BlockSpec((1, 2 * hf), lambda i: (0, 0)),
            pl.BlockSpec((heads, hf), lambda i: (0, 0)),
        ],
        out_specs=[
            pl.BlockSpec((tile_i, hf), lambda i: (i, 0)),     # xl
            pl.BlockSpec((tile_i, hf), lambda i: (i, 0)),     # xr
            pl.BlockSpec((hf, tile_i), lambda i: (0, i)),     # xl^T
            pl.BlockSpec((heads, tile_i), lambda i: (0, i)),  # lT
        ],
        out_shape=[
            jax.ShapeDtypeStruct((n_pad, hf), jnp.bfloat16),  # MXU operand only
            jax.ShapeDtypeStruct((n_pad, hf), cdt),
            jax.ShapeDtypeStruct((hf, n_pad), cdt),
            jax.ShapeDtypeStruct((heads, n_pad), jnp.float32),
        ],
        compiler_params=pltpu.CompilerParams(
            dimension_semantics=("parallel",),
            vmem_limit_bytes=_misc_vmem_limit()),
    )(x, w_cat, b_cat, att_bd)

    # --- attention + aggregation (online softmax over j-blocks) ---
    out = pl.pallas_call(
        partial(_gat_attn_kernel, heads=heads, out_dim=out_dim,
                apply_relu=apply_relu, tile_j=tile_j, compute_dtype=cdt),
        grid=(n_tiles,),
        in_specs=[
            pl.BlockSpec((tile_i, hf), lambda i: (i, 0)),        # xr block
            pl.BlockSpec((n_pad, hf), lambda i: (0, 0)),         # xl resident (bf16)
            pl.BlockSpec((hf, n_pad), lambda i: (0, 0)),         # xl^T resident
            pl.BlockSpec((heads, n_pad), lambda i: (0, 0)),      # lT resident
            pl.BlockSpec((tile_i, n_pad), lambda i: (i, 0)),     # adj rows (int8)
            pl.BlockSpec(memory_space=pltpu.MemorySpace.SMEM),   # att scalars
            pl.BlockSpec((1, hf), lambda i: (0, 0)),             # bias
        ],
        out_specs=pl.BlockSpec((tile_i, hf), lambda i: (i, 0)),
        out_shape=jax.ShapeDtypeStruct((n_pad, hf), jnp.float32),
        compiler_params=pltpu.CompilerParams(
            dimension_semantics=("parallel",),
            vmem_limit_bytes=_attn_vmem_limit(tile_i, tile_j, n_pad, hf, heads)),
    )(xr, xl, xlt, lt, adj, att_s, p["bias"])
    return out


def mlp_chain(x, layers, *, tile_i):
    """l1 + lin_list fused into a single pallas_call (ReLU after every layer)."""
    n_pad, f_in = x.shape
    n_tiles = n_pad // tile_i
    args = [x]
    in_specs = [pl.BlockSpec((tile_i, f_in), lambda i: (i, 0))]
    for (w, b) in layers:
        args.append(w)
        in_specs.append(pl.BlockSpec(w.shape, lambda i: (0, 0)))
        args.append(b.reshape(1, -1))
        in_specs.append(pl.BlockSpec((1, b.shape[-1]), lambda i: (0, 0)))
    out_dim = layers[-1][0].shape[1]
    return pl.pallas_call(
        partial(_mlp_kernel, n_layers=len(layers)),
        grid=(n_tiles,),
        in_specs=in_specs,
        out_specs=pl.BlockSpec((tile_i, out_dim), lambda i: (i, 0)),
        out_shape=jax.ShapeDtypeStruct((n_pad, out_dim), jnp.float32),
        compiler_params=pltpu.CompilerParams(
            dimension_semantics=("parallel",),
            vmem_limit_bytes=_misc_vmem_limit()),
    )(*args)


def edge_classifier(h, edge_index, wc, bc):
    """Fused real edge gather + concat + classifier; returns (out[E,C], e[E,2D])."""
    n_pad, d = h.shape
    e_cnt = edge_index.shape[1]
    c = wc.shape[1]
    c_pad = _round_up(max(c, 128), 128)          # lane-dense classifier output
    e_pad, te = _node_tiles(e_cnt, 256)
    n_tiles = e_pad // te

    src = jnp.zeros((e_pad,), jnp.int32).at[:e_cnt].set(edge_index[0])
    dst = jnp.zeros((e_pad,), jnp.int32).at[:e_cnt].set(edge_index[1])
    wc_p = jnp.zeros((2 * d, c_pad), jnp.float32).at[:, :c].set(wc)
    bc_p = jnp.zeros((1, c_pad), jnp.float32).at[:, :c].set(bc.reshape(1, -1))

    out, e = pl.pallas_call(
        _edge_classifier_kernel,
        grid=(n_tiles,),
        in_specs=[
            pl.BlockSpec(memory_space=pltpu.MemorySpace.SMEM),   # src indices
            pl.BlockSpec(memory_space=pltpu.MemorySpace.SMEM),   # dst indices
            pl.BlockSpec((n_pad, d), lambda i: (0, 0)),          # node feats resident
            pl.BlockSpec((2 * d, c_pad), lambda i: (0, 0)),
            pl.BlockSpec((1, c_pad), lambda i: (0, 0)),
        ],
        out_specs=[
            pl.BlockSpec((te, c_pad), lambda i: (i, 0)),
            pl.BlockSpec((te, 2 * d), lambda i: (i, 0)),
        ],
        out_shape=[
            jax.ShapeDtypeStruct((e_pad, c_pad), jnp.float32),
            jax.ShapeDtypeStruct((e_pad, 2 * d), jnp.float32),
        ],
        compiler_params=pltpu.CompilerParams(
            dimension_semantics=("parallel",),
            vmem_limit_bytes=_misc_vmem_limit()),
    )(src, dst, h, wc_p, bc_p)
    return out[:e_cnt, :c], e[:e_cnt]


# ----------------------------------------------------------------------------
# Parameter initialization (deterministic, glorot-uniform-ish)
# ----------------------------------------------------------------------------
def _glorot(key, shape):
    fan_in, fan_out = shape[0], shape[-1]
    lim = math.sqrt(6.0 / (fan_in + fan_out))
    return jax.random.uniform(key, shape, jnp.float32, -lim, lim)


def init_gatv2(key, in_ch, out_ch, heads):
    k1, k2, k3 = jax.random.split(key, 3)
    return {
        "wl": _glorot(k1, (in_ch, heads * out_ch)),
        "wr": _glorot(k2, (in_ch, heads * out_ch)),
        "bl": jnp.zeros((1, heads * out_ch), jnp.float32),
        "br": jnp.zeros((1, heads * out_ch), jnp.float32),
        "att": _glorot(k3, (heads, out_ch)),
        "bias": jnp.zeros((1, heads * out_ch), jnp.float32),
    }


def init_linear(key, in_ch, out_ch):
    return _glorot(key, (in_ch, out_ch)), jnp.zeros((out_ch,), jnp.float32)


def init_gatconv(key, num_features, num_classes, dim, num_heads, c_depth, l_depth):
    keys = jax.random.split(key, c_depth + l_depth + 2)
    params = {"conv1": init_gatv2(keys[0], num_features, dim, num_heads),
              "conv_list": [init_gatv2(keys[1 + i], dim * num_heads, dim, num_heads)
                            for i in range(c_depth - 1)]}
    params["l1"] = init_linear(keys[c_depth], dim * num_heads, dim)
    params["lin_list"] = [init_linear(keys[c_depth + 1 + i], dim, dim)
                          for i in range(l_depth - 1)]
    params["classifier"] = init_linear(keys[-1], dim * 2, num_classes)
    return params


# ----------------------------------------------------------------------------
# Forward pass (mirrors GATCONV.forward)
# ----------------------------------------------------------------------------
def gatconv_forward(params, x, edge_index, *, dim, num_heads):
    n = x.shape[0]
    n_pad, tile_i = _node_tiles(n, _MAX_NODE_TILE)

    # padded inputs; padded nodes never feed real nodes (no incoming edges)
    x_p = jnp.zeros((n_pad, x.shape[1]), jnp.float32).at[:n].set(x)

    # int8 adjacency mask with self loops (GATv2Conv add_self_loops=True);
    # self loops on padded rows keep every softmax row non-empty.
    adj = jnp.zeros((n_pad, n_pad), jnp.int8)
    adj = adj.at[edge_index[1], edge_index[0]].set(1)        # edge j -> i
    adj = adj.at[jnp.arange(n_pad), jnp.arange(n_pad)].set(1)

    h = gatv2_layer(x_p, adj, params["conv1"], heads=num_heads, out_dim=dim,
                    tile_i=tile_i)
    for p in params["conv_list"]:
        h = gatv2_layer(h, adj, p, heads=num_heads, out_dim=dim, tile_i=tile_i)

    # fused linear chain (l1 + lin_list) in one pallas_call
    h = mlp_chain(h, [params["l1"], *params["lin_list"]], tile_i=tile_i)

    # TODO(synk): dropout is identity (inference mode); torch RNG dropout not reproduced.

    # fused real edge gather + classifier (also returns e, as the module does)
    wc, bc = params["classifier"]
    out, e = edge_classifier(h, edge_index, wc, bc)
    return out, e


# ----------------------------------------------------------------------------
if __name__ == "__main__":
    N = 16             # nodes
    num_features = 8   # dataset.num_features
    num_classes = 3    # dataset.num_classes
    dim = 8
    num_heads = 2
    c_depth = 2
    l_depth = 2

    key = jax.random.PRNGKey(0)
    kx, kp = jax.random.split(key)

    x = jax.random.normal(kx, (N, num_features), jnp.float32)

    # deterministic ring-ish edge list, no self loops, no duplicates
    src, dst = [], []
    for i in range(N):
        for off in (1, 3, 7):
            src.append(i)
            dst.append((i + off) % N)
    edge_index = jnp.array([src, dst], dtype=jnp.int32)   # [2, 48]

    params = init_gatconv(kp, num_features, num_classes, dim, num_heads,
                          c_depth, l_depth)

    out, e = gatconv_forward(params, x, edge_index, dim=dim, num_heads=num_heads)
    jax.block_until_ready(out)
    jax.block_until_ready(e)

    assert out.shape == (edge_index.shape[1], num_classes)
    assert e.shape == (edge_index.shape[1], 2 * dim)
    print("KERNEL_OK")
</pallas_src>

<mosaic_0001>
module attributes {stable_mosaic.version = 11 : i64} {
  func.func @_gat_project_kernel(%arg0: i32, %arg1: memref<16x8xf32, #tpu.memory_space<vmem>>, %arg2: memref<8x32xf32, #tpu.memory_space<vmem>>, %arg3: memref<1x32xf32, #tpu.memory_space<vmem>>, %arg4: memref<2x16xf32, #tpu.memory_space<vmem>>, %arg5: memref<16x16xbf16, #tpu.memory_space<vmem>>, %arg6: memref<16x16xbf16, #tpu.memory_space<vmem>>, %arg7: memref<16x16xbf16, #tpu.memory_space<vmem>>, %arg8: memref<2x16xf32, #tpu.memory_space<vmem>>) attributes {dimension_semantics = [#tpu.dimension_semantics<parallel>], iteration_bounds = array<i64: 1>, scalar_prefetch = 0 : i64, scratch_operands = 0 : i64, tpu.core_type = #tpu.core_type<tc>, window_params = [{transform_indices = @transform_0, window_bounds = array<i64: 16, 8>}, {pipeline_mode = #tpu.pipeline_mode<synchronous>, transform_indices = @transform_1, window_bounds = array<i64: 8, 32>}, {pipeline_mode = #tpu.pipeline_mode<synchronous>, transform_indices = @transform_2, window_bounds = array<i64: 1, 32>}, {pipeline_mode = #tpu.pipeline_mode<synchronous>, transform_indices = @transform_3, window_bounds = array<i64: 2, 16>}, {transform_indices = @transform_4, window_bounds = array<i64: 16, 16>}, {transform_indices = @transform_5, window_bounds = array<i64: 16, 16>}, {transform_indices = @transform_6, window_bounds = array<i64: 16, 16>}, {transform_indices = @transform_7, window_bounds = array<i64: 2, 16>}]} {
    %c0 = arith.constant 0 : index
    %c0_0 = arith.constant 0 : index
    %0 = vector.load %arg1[%c0, %c0_0] : memref<16x8xf32, #tpu.memory_space<vmem>>, vector<16x8xf32>
    %1 = arith.truncf %0 : vector<16x8xf32> to vector<16x8xbf16>
    %c0_1 = arith.constant 0 : index
    %c0_2 = arith.constant 0 : index
    %2 = vector.load %arg2[%c0_1, %c0_2] : memref<8x32xf32, #tpu.memory_space<vmem>>, vector<8x32xf32>
    %3 = arith.truncf %2 : vector<8x32xf32> to vector<8x32xbf16>
    %cst = arith.constant dense<0.000000e+00> : vector<16x32xf32>
    %4 = tpu.matmul %1, %3, %cst {dimension_numbers = #tpu.dot_dimension_numbers<[1], [0], [0], [1], [0, 0, 1, 1], [], []>} : vector<16x8xbf16>, vector<8x32xbf16>, vector<16x32xf32> -> vector<16x32xf32>
    %c0_3 = arith.constant 0 : index
    %c0_4 = arith.constant 0 : index
    %5 = vector.load %arg3[%c0_3, %c0_4] : memref<1x32xf32, #tpu.memory_space<vmem>>, vector<1x32xf32>
    %6 = vector.broadcast %5 : vector<1x32xf32> to vector<16x32xf32>
    %7 = arith.addf %4, %6 : vector<16x32xf32>
    %8 = vector.extract_strided_slice %7 {offsets = [0, 0], sizes = [16, 16], strides = [1, 1]} : vector<16x32xf32> to vector<16x16xf32>
    %9 = vector.extract_strided_slice %7 {offsets = [0, 16], sizes = [16, 16], strides = [1, 1]} : vector<16x32xf32> to vector<16x16xf32>
    %10 = arith.truncf %8 : vector<16x16xf32> to vector<16x16xbf16>
    %c0_5 = arith.constant 0 : index
    %c0_6 = arith.constant 0 : index
    %11 = vector.load %arg5[%c0_5, %c0_6] : memref<16x16xbf16, #tpu.memory_space<vmem>>, vector<16x16xbf16>
    tpu.vector_store %arg5[%c0_5, %c0_6], %10 {strides = array<i32>} : memref<16x16xbf16, #tpu.memory_space<vmem>>, vector<16x16xbf16>,
    %12 = arith.truncf %9 : vector<16x16xf32> to vector<16x16xbf16>
    %c0_7 = arith.constant 0 : index
    %c0_8 = arith.constant 0 : index
    %13 = vector.load %arg6[%c0_7, %c0_8] : memref<16x16xbf16, #tpu.memory_space<vmem>>, vector<16x16xbf16>
    tpu.vector_store %arg6[%c0_7, %c0_8], %12 {strides = array<i32>} : memref<16x16xbf16, #tpu.memory_space<vmem>>, vector<16x16xbf16>,
    %14 = tpu.transpose %8, [1, 0] : vector<16x16xf32> -> vector<16x16xf32>
    %15 = arith.truncf %14 : vector<16x16xf32> to vector<16x16xbf16>
    %c0_9 = arith.constant 0 : index
    %c0_10 = arith.constant 0 : index
    %16 = vector.load %arg7[%c0_9, %c0_10] : memref<16x16xbf16, #tpu.memory_space<vmem>>, vector<16x16xbf16>
    tpu.vector_store %arg7[%c0_9, %c0_10], %15 {strides = array<i32>} : memref<16x16xbf16, #tpu.memory_space<vmem>>, vector<16x16xbf16>,
    %c0_11 = arith.constant 0 : index
    %c0_12 = arith.constant 0 : index
    %17 = vector.load %arg4[%c0_11, %c0_12] : memref<2x16xf32, #tpu.memory_space<vmem>>, vector<2x16xf32>
    %cst_13 = arith.constant dense<0.000000e+00> : vector<2x16xf32>
    %18 = tpu.matmul %17, %14, %cst_13 {dimension_numbers = #tpu.dot_dimension_numbers<[1], [0], [0], [1], [0, 0, 1, 1], [], []>} : vector<2x16xf32>, vector<16x16xf32>, vector<2x16xf32> -> vector<2x16xf32>
    %c0_14 = arith.constant 0 : index
    %c0_15 = arith.constant 0 : index
    %19 = vector.load %arg8[%c0_14, %c0_15] : memref<2x16xf32, #tpu.memory_space<vmem>>, vector<2x16xf32>
    tpu.vector_store %arg8[%c0_14, %c0_15], %18 {strides = array<i32>} : memref<2x16xf32, #tpu.memory_space<vmem>>, vector<2x16xf32>,
    return
  }
  func.func @transform_0(%arg0: i32) -> (i32, i32) {
    %c0_i32 = arith.constant 0 : i32
    %c0_i32_0 = arith.constant 0 : i32
    return %arg0, %c0_i32 : i32, i32
  }
  func.func @transform_1(%arg0: i32) -> (i32, i32) {
    %c0_i32 = arith.constant 0 : i32
    %c0_i32_0 = arith.constant 0 : i32
    %c0_i32_1 = arith.constant 0 : i32
    return %c0_i32, %c0_i32_0 : i32, i32
  }
  func.func @transform_2(%arg0: i32) -> (i32, i32) {
    %c0_i32 = arith.constant 0 : i32
    %c0_i32_0 = arith.constant 0 : i32
    %c0_i32_1 = arith.constant 0 : i32
    return %c0_i32, %c0_i32_0 : i32, i32
  }
  func.func @transform_3(%arg0: i32) -> (i32, i32) {
    %c0_i32 = arith.constant 0 : i32
    %c0_i32_0 = arith.constant 0 : i32
    %c0_i32_1 = arith.constant 0 : i32
    return %c0_i32, %c0_i32_0 : i32, i32
  }
  func.func @transform_4(%arg0: i32) -> (i32, i32) {
    %c0_i32 = arith.constant 0 : i32
    %c0_i32_0 = arith.constant 0 : i32
    return %arg0, %c0_i32 : i32, i32
  }
  func.func @transform_5(%arg0: i32) -> (i32, i32) {
    %c0_i32 = arith.constant 0 : i32
    %c0_i32_0 = arith.constant 0 : i32
    return %arg0, %c0_i32 : i32, i32
  }
  func.func @transform_6(%arg0: i32) -> (i32, i32) {
    %c0_i32 = arith.constant 0 : i32
    %c0_i32_0 = arith.constant 0 : i32
    return %c0_i32, %arg0 : i32, i32
  }
  func.func @transform_7(%arg0: i32) -> (i32, i32) {
    %c0_i32 = arith.constant 0 : i32
    %c0_i32_0 = arith.constant 0 : i32
    return %c0_i32, %arg0 : i32, i32
  }
}

</mosaic_0001>

<bundles_post_ra>
// kernel: tpu_custom_call.1
= control target key start
LH: loop header
LB: loop body
LE: loop exit
PB: predicated region body
PF: predicated region fallthrough
CT: control target
= control target key end

     0   :  { %13 = vsyncpa [#allocation3], 0  ;;  %s747_s0 = inlined_call_operand.hbm [shape: f32[16,8], index: 0, kind: input, shape index: {}]   ;;  %s748_s1 = inlined_call_operand.hbm [shape: f32[8,32], index: 1, kind: input, shape index: {}]   ;;  %s749_s2 = inlined_call_operand.hbm [shape: f32[1,32], index: 2, kind: input, shape index: {}]   ;;  %s750_s3 = inlined_call_operand.hbm [shape: f32[2,16], index: 3, kind: input, shape index: {}]   ;;  %s751_s4 = inlined_call_operand.hbm [shape: bf16[16,16], index: 4, kind: output, shape index: {0}]   ;;  %s752_s5 = inlined_call_operand.hbm [shape: bf16[16,16], index: 5, kind: output, shape index: {1}]   ;;  %s753_s6 = inlined_call_operand.hbm [shape: bf16[16,16], index: 6, kind: output, shape index: {2}]   ;;  %s754_s7 = inlined_call_operand.hbm [shape: f32[2,16], index: 7, kind: output, shape index: {3}]  }
   0x1   :  { %14 = vsyncpa [#allocation6], 0 }
   0x2   :  { %15 = vsyncpa [#allocation9], 0 }
   0x3   :  { %16 = vsyncpa [#allocation4], 0 }
   0x4   :  { %17 = vsyncpa [#allocation12], 0 }
   0x5   :  { %18 = vsyncpa [#allocation15], 0  ;;  %s573_s24 = smov [#allocation5]   ;;  %s574_s26 = smov [#allocation2]  }
   0x6   :  { %s37_s25 = sshll.u32 %s573_s24, 4  ;;  %s24_s27 = sshll.u32 %s574_s26, 4  ;;  %s38_s25 = int_to_ptr.vmem [resolvable:$true] %s37_s25  ;;  %s629_s27 = int_to_ptr.vmem [resolvable:$true] %s24_s27 }
   0x7   :  { %s385_s30 = scalar_lea.hbm %s748_s1, 128 }
   0x8   :  { %p386_p0 = scmp.ne.s32.totalorder %s748_s1, %s385_s30  ;;  %p389_p1 = scmp.lt.u32.totalorder %s385_s30, %s748_s1 }
   0xa   :  { %p391_p2 = pnand %p389_p1, %p386_p0 }
   0xc   :  { %394 = shalt.err (!%p391_p2)
}
   0xd   :  { %s395_s12 = scalar_lea.vmem %s38_s25, 128  ;;  %p400_p4 = scmp.lt.s32.totalorder %s38_s25, %s38_s25 }
   0xe   :  { %p396_p3 = scmp.ne.s32.totalorder %s38_s25, %s395_s12  ;;  %p401_p5 = scmp.lt.s32.totalorder %s395_s12, %s395_s12 }
  0x10   :  { %p402_p6 = por %p401_p5, %p400_p4 }
  0x12   :  { %p403_p7 = pnand %p402_p6, %p396_p3 }
  0x14   :  { %406 = shalt.err (!%p403_p7)
}
  0x15   :  { %40 = dma.hbm_to_vmem [thread:$0]  %s748_s1, 128, %s38_s25, [#allocation6]  }
  0x16   :  { %s407_s17 = scalar_lea.hbm %s747_s0, 256 }
  0x17   :  { %p408_p8 = scmp.ne.s32.totalorder %s747_s0, %s407_s17  ;;  %p411_p9 = scmp.lt.u32.totalorder %s407_s17, %s747_s0 }
  0x19   :  { %p413_p10 = pnand %p411_p9, %p408_p8 }
  0x1b   :  { %416 = shalt.err (!%p413_p10)
}
  0x1c   :  { %s417_s22 = scalar_lea.vmem %s629_s27, 256  ;;  %p422_p12 = scmp.lt.s32.totalorder %s629_s27, %s629_s27 }
  0x1d   :  { %p418_p11 = scmp.ne.s32.totalorder %s629_s27, %s417_s22  ;;  %p423_p13 = scmp.lt.s32.totalorder %s417_s22, %s417_s22 }
  0x1f   :  { %p424_p0 = por %p423_p13, %p422_p12 }
  0x21   :  { %p425_p1 = pnand %p424_p0, %p418_p11 }
  0x23   :  { %428 = shalt.err (!%p425_p1)
}
  0x24   :  { %s575_s1 = smov 128   ;;  %s576_s23 = smov 8  }
  0x25   :  { %30 = dma.hbm_to_vmem [thread:$0]  %s747_s0, 256, %s629_s27, [#allocation3], %s575_s1, %s575_s1, %s576_s23  }
  0x26   :  { %s577_s26 = smov [#allocation7]   ;;  %s578_s29 = smov [#allocation8]  }
  0x27   :  { %s47_s28 = sshll.u32 %s577_s26, 4  ;;  %s57_s30 = sshll.u32 %s578_s29, 4  ;;  %s48_s28 = int_to_ptr.vmem [resolvable:$true] %s47_s28  ;;  %s58_s30 = int_to_ptr.vmem [resolvable:$true] %s57_s30 }
  0x28   :  { %s429_s10 = scalar_lea.hbm %s749_s2, 16 }
  0x29   :  { %p430_p2 = scmp.ne.s32.totalorder %s749_s2, %s429_s10  ;;  %p433_p3 = scmp.lt.u32.totalorder %s429_s10, %s749_s2 }
  0x2b   :  { %p435_p4 = pnand %p433_p3, %p430_p2 }
  0x2d   :  { %438 = shalt.err (!%p435_p4)
}
  0x2e   :  { %s439_s0 = scalar_lea.vmem %s48_s28, 16  ;;  %s443_s27 = scalar_lea.vmem %s48_s28, 32 }
  0x2f   :  { %p440_p5 = scmp.ne.s32.totalorder %s48_s28, %s439_s0  ;;  %p444_p6 = scmp.lt.s32.totalorder %s48_s28, %s48_s28 }
  0x30   :  { %p445_p7 = scmp.lt.s32.totalorder %s443_s27, %s439_s0 }
  0x32   :  { %p446_p8 = por %p445_p7, %p444_p6 }
  0x34   :  { %p447_p9 = pnand %p446_p8, %p440_p5 }
  0x36   :  { %450 = shalt.err (!%p447_p9)
}
  0x37   :  { %50 = dma.hbm_to_vmem [thread:$0]  %s749_s2, 16, %s48_s28, [#allocation6]  }
  0x38   :  { %s451_s19 = scalar_lea.hbm %s750_s3, 32 }
  0x39   :  { %p452_p10 = scmp.ne.s32.totalorder %s750_s3, %s451_s19  ;;  %p455_p11 = scmp.lt.u32.totalorder %s451_s19, %s750_s3 }
  0x3b   :  { %p457_p12 = pnand %p455_p11, %p452_p10 }
  0x3d   :  { %460 = shalt.err (!%p457_p12)
}
  0x3e   :  { %s461_s23 = scalar_lea.vmem %s58_s30, 32  ;;  %p466_p0 = scmp.lt.s32.totalorder %s58_s30, %s58_s30 }
  0x3f   :  { %p462_p13 = scmp.ne.s32.totalorder %s58_s30, %s461_s23  ;;  %p467_p1 = scmp.lt.s32.totalorder %s461_s23, %s461_s23 }
  0x41   :  { %p468_p2 = por %p467_p1, %p466_p0 }
  0x43   :  { %p469_p3 = pnand %p468_p2, %p462_p13 }
  0x45   :  { %472 = shalt.err (!%p469_p3)
}
  0x46   :  { %60 = dma.hbm_to_vmem [thread:$0]  %s750_s3, 32, %s58_s30, [#allocation9]  }
  0x47   :  { %561 = dma.done.wait [#allocation3], 256  }
  0x48   :  { %562 = vsyncadd [#allocation3], 4294967040 }
  0x49   :  { %563 = dma.done.wait [#allocation6], 144  }
  0x4a   :  { %564 = vsyncadd [#allocation6], 4294967152 }
  0x4b   :  { %565 = dma.done.wait [#allocation9], 32  }
  0x4c   :  { %566 = vsyncadd [#allocation9], 4294967264  ;;  %v579_v0 = vmov 0.0   ;;  %vm580_vm0 = vmmov 0   ;;  %v77_v1 = vld [vmem:[#allocation5] sm:$0xff]  ;;  %vm90_vm1 = vcmask 1043456  }
  0x4d   :  { %353 = vmatprep.subr.bf16.mxu0 %v579_v0  ;;  %355 = vmatprep.mubr.msk.bf16.mxu0 %vm580_vm0, %v579_v0  ;;  %v74_v2 = vld [vmem:[#allocation2] sm:$0xff]  ;;  %v75_v3 = vld [vmem:[#allocation2 + $0x8] sm:$0xff]  ;;  %v78_v4 = vpack.c.bf16 %v77_v1, %v77_v1  ;;  %vm86_vm2 = vcmask 64512   ;;  %v337_v7 = vld [vmem:[#allocation7] ss:$0 sm:$0xff]  ;;  %vm143_vm3 = vcmask 125952  }
  0x4e   :  { %363 = vmatprep.mubr.msk.f32.mxu1 %vm580_vm0, %v579_v0  ;;  %v76_v6 = vpack.c.bf16 %v75_v3, %v74_v2  ;;  %s581_s3 = smov 112   ;;  %v582_v16 = vmov 0.0|0.0   ;;  %v196_v24 = vld [vmem:[#allocation8] sm:$0x3]  ;;  %vm197_vm4 = vcmask 130048   ;;  %s583_s25 = smov [#allocation11]  }
  0x4f   :  { %v92_v5 = vsel %vm90_vm1, %v78_v4, 0  ;;  %366 = vmatprep.subr.bf16.mxu1 %v582_v16  ;;  %s290_s26 = sshll.u32 %s583_s25, 4  ;;  %s584_s28 = smov [#allocation10]   ;;  %s291_s26 = int_to_ptr.vmem [resolvable:$true] %s290_s26 }
  0x50   :  { %354 = vmatpush3.bf16.msra.mxu0 %v92_v5  ;;  %s278_s29 = sshll.u32 %s584_s28, 4  ;;  %s473_s30 = scalar_lea.vmem %s291_s26, 128  ;;  %s279_s29 = int_to_ptr.vmem [resolvable:$true] %s278_s29 }
  0x51   :  { %p474_p4 = scmp.ne.s32.totalorder %s291_s26, %s473_s30  ;;  %p478_p5 = scmp.lt.s32.totalorder %s291_s26, %s291_s26 }
  0x52   :  { %p479_p6 = scmp.lt.s32.totalorder %s473_s30, %s473_s30 }
  0x53   :  { %356 = vmatmul.mubr.msk.bf16.vlgmr.msra.gmra.mrb[0].mxu0 %vm86_vm2, %v76_v6 }
  0x54   :  { %p480_p7 = por %p479_p6, %p478_p5 }
  0x56   :  { %p481_p8 = pnand %p480_p7, %p474_p4 }
 0x126   :  { %v128_v8 = vpop.f32.mrb[0].mxu0 }
 0x127   :  { %v129_v9 = vadd.f32 %v337_v7, %v128_v8  ;;  %v357_v10 = vpop.f32.mrb[1].mxu0 }
 0x128   :  { %v131_v11 = vpop.f32.mrb[2].mxu0 }
 0x129   :  { %v132_v12 = vadd.f32 %v337_v7, %v131_v11  ;;  %154 = vxpose.xlu0.b32.start [1/2] (short) (narrow) %v129_v9, 16  ;;  %v358_v13 = vpop.f32.mrb[3].mxu0  ;;  %v344_v14 = vpack.c.bf16 %v129_v9, %v129_v9 }
 0x12b   :  { %v345_v15 = vpack.c.bf16 %v132_v12, %v132_v12  ;;  %146 = vrot.lane.b32.xlu1 %v344_v14, %s581_s3  ;;  %144 = vst.msk [vmem:[#allocation10] sm:$0xf] %vm143_vm3, %v344_v14 }
 0x12d   :  { %145 = vst.msk [vmem:[#allocation10 + $0x4] sm:$0xf] %vm143_vm3, %v345_v15  ;;  %155 = vxpose.xlu0.b32.end [2/2] (short) (narrow) %v132_v12, 16 }
 0x12f   :  { %148 = vrot.lane.b32.xlu1 %v345_v15, %s581_s3 }
 0x19d   :  { %v147_v17 = vpop.permute.xlu1 %146 }
 0x19e   :  { %152 = vst.msk [vmem:[#allocation11] sm:$0xf] %vm143_vm3, %v147_v17 }
 0x1a1   :  { %v149_v18 = vpop.permute.xlu1 %148 }
 0x1a2   :  { %153 = vst.msk [vmem:[#allocation11 + $0x4] sm:$0xf] %vm143_vm3, %v149_v18 }
 0x1a9   :  { %v170_v19 = vpop.trf.xlu0 }
 0x1aa   :  { %v346_v20 = vpack.c.bf16 %v170_v19, %v170_v19 }
 0x1ac   :  { %194 = vst.msk [vmem:[#allocation13] sm:$0xf] %vm143_vm3, %v346_v20 }
 0x1ad   :  { %v171_v21 = vpop.trf.xlu0 }
 0x1ae   :  { %v347_v22 = vpack.c.bf16 %v171_v21, %v171_v21  ;;  %v367_v23 = vpack.c.bf16 %v171_v21, %v170_v19 }
 0x1b0   :  { %195 = vst.msk [vmem:[#allocation13 + $0x4] sm:$0xf] %vm143_vm3, %v347_v22  ;;  %368 = vmatpush3.bf16.msra.mxu1 %v367_v23 }
 0x1b3   :  { %364 = vmatmul.mubr.msk.f32.vlgmr.msra.gmra.mrb[0].mxu1 %vm197_vm4, %v196_v24 }
 0x1b4   :  { %484 = shalt.err (!%p481_p8)
}
 0x1b5   :  { %s485_s10 = scalar_lea.hbm %s752_s5, 128 }
 0x1b6   :  { %p486_p9 = scmp.ne.s32.totalorder %s752_s5, %s485_s10  ;;  %p489_p10 = scmp.lt.u32.totalorder %s485_s10, %s752_s5 }
 0x1b8   :  { %p491_p11 = pnand %p489_p10, %p486_p9 }
 0x1ba   :  { %494 = shalt.err (!%p491_p11)
}
 0x1bb   :  { %s585_s0 = smov 64   ;;  %s586_s27 = smov 4  }
 0x1bc   :  { %296 = dma.vmem_to_hbm [thread:$0]  %s291_s26, 128, %s752_s5, [#allocation12], %s585_s0, %s585_s0, %s586_s27  }
 0x1bd   :  { %s495_s17 = scalar_lea.vmem %s279_s29, 128  ;;  %p500_p13 = scmp.lt.s32.totalorder %s279_s29, %s279_s29 }
 0x1be   :  { %p496_p12 = scmp.ne.s32.totalorder %s279_s29, %s495_s17  ;;  %p501_p0 = scmp.lt.s32.totalorder %s495_s17, %s495_s17 }
 0x1c0   :  { %p502_p1 = por %p501_p0, %p500_p13 }
 0x1c2   :  { %p503_p2 = pnand %p502_p1, %p496_p12 }
 0x1c4   :  { %506 = shalt.err (!%p503_p2)
}
 0x1c5   :  { %s507_s20 = scalar_lea.hbm %s751_s4, 128 }
 0x1c6   :  { %p508_p3 = scmp.ne.s32.totalorder %s751_s4, %s507_s20  ;;  %p511_p4 = scmp.lt.u32.totalorder %s507_s20, %s751_s4 }
 0x1c8   :  { %p513_p5 = pnand %p511_p4, %p508_p3 }
 0x1ca   :  { %516 = shalt.err (!%p513_p5)
}
 0x1cb   :  { %284 = dma.vmem_to_hbm [thread:$0]  %s279_s29, 128, %s751_s4, [#allocation4], %s585_s0, %s585_s0, %s586_s27  }
 0x1cc   :  { %s587_s24 = smov [#allocation13]  }
 0x1cd   :  { %s302_s3 = sshll.u32 %s587_s24, 4  ;;  %s303_s3 = int_to_ptr.vmem [resolvable:$true] %s302_s3 }
 0x1ce   :  { %s517_s25 = scalar_lea.vmem %s303_s3, 128  ;;  %p522_p7 = scmp.lt.s32.totalorder %s303_s3, %s303_s3 }
 0x1cf   :  { %p518_p6 = scmp.ne.s32.totalorder %s303_s3, %s517_s25  ;;  %p523_p8 = scmp.lt.s32.totalorder %s517_s25, %s517_s25 }
 0x1d1   :  { %p524_p9 = por %p523_p8, %p522_p7 }
 0x1d3   :  { %p525_p10 = pnand %p524_p9, %p518_p6 }
 0x1d5   :  { %528 = shalt.err (!%p525_p10)
}
 0x1d6   :  { %s529_s30 = scalar_lea.hbm %s753_s6, 128 }
 0x1d7   :  { %p530_p11 = scmp.ne.s32.totalorder %s753_s6, %s529_s30  ;;  %p533_p12 = scmp.lt.u32.totalorder %s529_s30, %s753_s6 }
 0x1d9   :  { %p535_p13 = pnand %p533_p12, %p530_p11 }
 0x1db   :  { %538 = shalt.err (!%p535_p13)
}
 0x1dc   :  { %308 = dma.vmem_to_hbm [thread:$0]  %s303_s3, 128, %s753_s6, [#allocation12], %s585_s0, %s585_s0, %s586_s27   ;;  %vm271_vm5 = vcmask 123904  }
 0x1dd   :  { %s588_s12 = smov [#allocation14]  }
 0x1de   :  { %s315_s13 = sshll.u32 %s588_s12, 4  ;;  %s316_s13 = int_to_ptr.vmem [resolvable:$true] %s315_s13 }
 0x1df   :  { %s539_s14 = scalar_lea.vmem %s316_s13, 32  ;;  %p544_p1 = scmp.lt.s32.totalorder %s316_s13, %s316_s13 }
 0x1e0   :  { %p540_p0 = scmp.ne.s32.totalorder %s316_s13, %s539_s14  ;;  %p545_p2 = scmp.lt.s32.totalorder %s539_s14, %s539_s14 }
 0x1e2   :  { %p546_p3 = por %p545_p2, %p544_p1 }
 0x1e4   :  { %p547_p4 = pnand %p546_p3, %p540_p0 }
 0x286   :  { %v267_v25 = vpop.f32.mrb[0].mxu1 }
 0x287   :  { %v365_v26 = vpop.f32.mrb[1].mxu1  ;;  %272 = vst.msk [vmem:[#allocation14] sm:$0x3] %vm271_vm5, %v267_v25 }
 0x288   :  { %550 = shalt.err (!%p547_p4)
}
 0x289   :  { %s551_s17 = scalar_lea.hbm %s754_s7, 32 }
 0x28a   :  { %p552_p5 = scmp.ne.s32.totalorder %s754_s7, %s551_s17  ;;  %p555_p6 = scmp.lt.u32.totalorder %s551_s17, %s754_s7 }
 0x28c   :  { %p557_p7 = pnand %p555_p6, %p552_p5 }
 0x28e   :  { %560 = shalt.err (!%p557_p7)
}
 0x28f   :  { %318 = dma.vmem_to_hbm [thread:$0]  %s316_s13, 32, %s754_s7, [#allocation15]  }
 0x290   :  { %567 = dma.done.wait [#allocation4], 128  }
 0x291   :  { %568 = vsyncadd [#allocation4], 4294967168 }
 0x292   :  { %569 = dma.done.wait [#allocation12], 256  }
 0x293   :  { %570 = vsyncadd [#allocation12], 4294967040 }
 0x294   :  { %571 = dma.done.wait [#allocation15], 32  }
 0x295   :  { %572 = vsyncadd [#allocation15], 4294967264 }
 0x296   :  { %331 = vsyncpa [#allocation3], 1 }
 0x297   :  { %332 = vsyncpa [#allocation6], 1 }
 0x298   :  { %333 = vsyncpa [#allocation9], 1 }
 0x299   :  { %334 = vsyncpa [#allocation4], 1 }
 0x29a   :  { %335 = vsyncpa [#allocation12], 1 }
 0x29b   :  { %336 = vsyncpa [#allocation15], 1 }

</bundles_post_ra>
